<compile_context>
chip_gen: v6e
topology: v6e:2x2x1
jax: 0.10.0
libtpu: 0.0.40
codegen_flags: <defaults>
</compile_context>

<pallas_src>
import functools

import jax
import jax.numpy as jnp
from jax.experimental import pallas as pl
from jax.experimental.pallas import tpu as pltpu

LANES = 128
MAX_TILE_ROWS = 2048   # (2048, 128) f32 block = 1 MiB; 2 inputs x 2 buffers = 4 MiB VMEM
PART_ROWS = 8          # full-sublane partials block -> single unmasked store
SMOOTH = 1e-6


def _dice_bce_partials_kernel(x_ref, t_ref, part_ref, *,
                              rows_total, tile_rows, needs_mask):
    x = x_ref[...].astype(jnp.float32)
    t = t_ref[...].astype(jnp.float32)

    if needs_mask:
        # The slab is lane-exact, so only the last grid block can be partial and
        # validity is a single row-index compare.  x -> -1e9 makes both the BCE
        # term and sigmoid(x) exactly 0; t -> 0 kills the target sums.  Applied
        # before ANY arithmetic so OOB garbage (even NaN) can never poison the
        # sums (jnp.where selects the finite operand at masked positions).
        row = jax.lax.broadcasted_iota(jnp.int32, x.shape, 0)
        valid = (pl.program_id(0) * tile_rows + row) < rows_total
        x = jnp.where(valid, x, -1e9)
        t = jnp.where(valid, t, 0.0)

    # Shared exp(-|x|) for the stable BCE-with-logits term AND the sigmoid:
    #   BCE        = max(x, 0) - x*t + log1p(e),     e = exp(-|x|)
    #   sigmoid(x) = 1/(1+e)  if x >= 0   else   e/(1+e)
    e = jnp.exp(-jnp.abs(x))
    d = 1.0 + e
    bce = jnp.maximum(x, 0.0) - x * t + jnp.log1p(e)
    inv = pl.reciprocal(d, approx=True)
    inv = inv * (2.0 - d * inv)        # one Newton step: near-exact 1/(1+e), hides under DMA
    p = jnp.where(x >= 0.0, inv, e * inv)

    # Per-lane partial sums (sublane reduce only; the cross-lane reduce happens
    # once, outside the kernel).  Single unmasked (8, 128) store.
    part_ref[...] = jnp.concatenate(
        [jnp.sum(bce, axis=0, keepdims=True),
         jnp.sum(p * t, axis=0, keepdims=True),
         jnp.sum(p + t, axis=0, keepdims=True),
         jnp.zeros((PART_ROWS - 3, LANES), jnp.float32)],
        axis=0)


def dice_bce_loss(inputs, targets):
    """Pallas-TPU DiceBCELoss forward. `inputs` are logits, `targets` in [0, 1].

    Inputs/targets may be f32, bf16, or (targets) int8/bool: they are streamed
    in their native dtype and cast to f32 inside the kernel.
    """
    assert inputs.shape == targets.shape
    n = inputs.size

    x_flat = inputs.reshape(-1)
    t_flat = targets.reshape(-1)

    rows = n // LANES
    n_main = rows * LANES

    bce_sum = jnp.float32(0.0)
    inter_sum = jnp.float32(0.0)
    pt_sum = jnp.float32(0.0)

    if rows > 0:
        # Lane-aligned prefix: contiguous slice + reshape (no HBM copy).
        x2 = x_flat[:n_main].reshape(rows, LANES)
        t2 = t_flat[:n_main].reshape(rows, LANES)

        if rows <= 8:
            tile_rows = rows            # full-dim block, grid of 1, no mask
            grid = 1
        else:
            # At least 2 blocks (v7x megacore), capped at MAX_TILE_ROWS, rows
            # multiple of 8 so the block shape is always legal.
            half = -(-rows // 2)
            tile_rows = min(MAX_TILE_ROWS, ((half + 7) // 8) * 8)
            grid = pl.cdiv(rows, tile_rows)

        needs_mask = (grid * tile_rows) != rows

        kernel = functools.partial(
            _dice_bce_partials_kernel,
            rows_total=rows, tile_rows=tile_rows, needs_mask=needs_mask)

        bytes_accessed = (x2.size * x2.dtype.itemsize
                          + t2.size * t2.dtype.itemsize
                          + grid * PART_ROWS * LANES * 4)
        cost = pl.CostEstimate(flops=16 * n_main,
                               transcendentals=3 * n_main,
                               bytes_accessed=bytes_accessed)

        parts = pl.pallas_call(
            kernel,
            out_shape=jax.ShapeDtypeStruct((grid, PART_ROWS, LANES), jnp.float32),
            grid_spec=pltpu.PrefetchScalarGridSpec(
                num_scalar_prefetch=0,
                grid=(grid,),
                in_specs=[
                    pl.BlockSpec((tile_rows, LANES), lambda i: (i, 0)),
                    pl.BlockSpec((tile_rows, LANES), lambda i: (i, 0)),
                ],
                # Leading grid dim squeezed -> kernel sees an (8, 128) block.
                out_specs=pl.BlockSpec((None, PART_ROWS, LANES),
                                       lambda i: (i, 0, 0)),
            ),
            compiler_params=pltpu.CompilerParams(
                dimension_semantics=("parallel",)),
            cost_estimate=cost,
        )(x2, t2)

        bce_sum = jnp.sum(parts[:, 0, :])
        inter_sum = jnp.sum(parts[:, 1, :])
        pt_sum = jnp.sum(parts[:, 2, :])

    if n_main < n:
        # < 128-element lane tail: fold into the plain-JAX combine instead of
        # padding (and re-copying) the whole array just to lane-align it.
        xt = x_flat[n_main:].astype(jnp.float32)
        tt = t_flat[n_main:].astype(jnp.float32)
        bce_sum = bce_sum + jnp.sum(
            jnp.maximum(xt, 0.0) - xt * tt + jnp.log1p(jnp.exp(-jnp.abs(xt))))
        pt_tail = jax.nn.sigmoid(xt)
        inter_sum = inter_sum + jnp.sum(pt_tail * tt)
        pt_sum = pt_sum + jnp.sum(pt_tail) + jnp.sum(tt)

    bce_mean = bce_sum / jnp.float32(n)
    dice = 1.0 - (2.0 * inter_sum + SMOOTH) / (pt_sum + SMOOTH)
    return bce_mean + dice


def _reference_dice_bce(inputs, targets):
    x = inputs.reshape(-1).astype(jnp.float32)
    t = targets.reshape(-1).astype(jnp.float32)
    bce = jnp.mean(jnp.maximum(x, 0.0) - x * t + jnp.log1p(jnp.exp(-jnp.abs(x))))
    p = jax.nn.sigmoid(x)
    inter = jnp.sum(p * t)
    dice = 1.0 - (2.0 * inter + SMOOTH) / (jnp.sum(p) + jnp.sum(t) + SMOOTH)
    return bce + dice


if __name__ == "__main__":
    key = jax.random.PRNGKey(0)
    k1, k2, k3, k4, k5, k6, k7, k8, k9, k10 = jax.random.split(key, 10)

    # With the Newton-refined reciprocal, the only differences vs the reference
    # are f32 summation order; 1e-3 is comfortably loose.
    TOL = dict(rtol=1e-3, atol=1e-3)

    # Main case: NCHW segmentation-style logits/targets (grid of 2, no mask).
    inputs = jax.random.normal(k1, (2, 4, 16, 16), dtype=jnp.float32)
    targets = (jax.random.uniform(k2, (2, 4, 16, 16)) > 0.5).astype(jnp.float32)
    loss = dice_bce_loss(inputs, targets)
    jax.block_until_ready(loss)
    ref = _reference_dice_bce(inputs, targets)
    assert jnp.allclose(loss, ref, **TOL), (loss, ref)

    # Multi-tile case with a row-partial last block (exercises masking).
    x2 = jax.random.normal(k3, (2, 4, 96, 100), dtype=jnp.float32)
    t2 = (jax.random.uniform(k4, (2, 4, 96, 100)) > 0.5).astype(jnp.float32)
    l2 = dice_bce_loss(x2, t2)
    jax.block_until_ready(l2)
    assert jnp.allclose(l2, _reference_dice_bce(x2, t2), **TOL), l2

    # Non-lane-aligned case (exercises the plain-JAX lane tail + row mask).
    x3 = jax.random.normal(k5, (3, 5, 7, 11), dtype=jnp.float32)
    t3 = (jax.random.uniform(k6, (3, 5, 7, 11)) > 0.5).astype(jnp.float32)
    l3 = dice_bce_loss(x3, t3)
    jax.block_until_ready(l3)
    assert jnp.allclose(l3, _reference_dice_bce(x3, t3), **TOL), l3

    # bf16 logits / f32 targets: streamed un-upcast, cast to f32 in-kernel.
    x4 = jax.random.normal(k7, (2, 4, 32, 32), dtype=jnp.bfloat16)
    t4 = (jax.random.uniform(k8, (2, 4, 32, 32)) > 0.5).astype(jnp.float32)
    l4 = dice_bce_loss(x4, t4)
    jax.block_until_ready(l4)
    assert jnp.allclose(l4, _reference_dice_bce(x4, t4), **TOL), l4

    # Tiny input (< 128 elements): pure plain-JAX tail path, no kernel launch.
    x5 = jax.random.normal(k9, (3, 7, 5), dtype=jnp.float32)
    t5 = (jax.random.uniform(k10, (3, 7, 5)) > 0.5).astype(jnp.float32)
    l5 = dice_bce_loss(x5, t5)
    jax.block_until_ready(l5)
    assert jnp.allclose(l5, _reference_dice_bce(x5, t5), **TOL), l5

    print("KERNEL_OK")
</pallas_src>

<mosaic_0001>
module attributes {stable_mosaic.version = 11 : i64} {
  func.func @_dice_bce_partials_kernel(%arg0: i32, %arg1: memref<8x128xf32, #tpu.memory_space<vmem>>, %arg2: memref<8x128xf32, #tpu.memory_space<vmem>>, %arg3: memref<1x8x128xf32, #tpu.memory_space<vmem>>) attributes {dimension_semantics = [#tpu.dimension_semantics<parallel>], iteration_bounds = array<i64: 2>, scalar_prefetch = 0 : i64, scratch_operands = 0 : i64, tpu.core_type = #tpu.core_type<tc>, window_params = [{transform_indices = @transform_0, window_bounds = array<i64: 8, 128>}, {transform_indices = @transform_1, window_bounds = array<i64: 8, 128>}, {transform_indices = @transform_2, window_bounds = array<i64: 1, 8, 128>}]} {
    %c0 = arith.constant 0 : index
    %c0_0 = arith.constant 0 : index
    %0 = vector.load %arg1[%c0, %c0_0] : memref<8x128xf32, #tpu.memory_space<vmem>>, vector<8x128xf32>
    %c0_1 = arith.constant 0 : index
    %c0_2 = arith.constant 0 : index
    %1 = vector.load %arg2[%c0_1, %c0_2] : memref<8x128xf32, #tpu.memory_space<vmem>>, vector<8x128xf32>
    %2 = math.absf %0 : vector<8x128xf32>
    %cst = arith.constant 0.000000e+00 : f32
    %3 = vector.broadcast %cst : f32 to vector<8x128xf32>
    %4 = arith.subf %3, %2 : vector<8x128xf32>
    %5 = math.exp %4 : vector<8x128xf32>
    %cst_3 = arith.constant 1.000000e+00 : f32
    %6 = vector.broadcast %cst_3 : f32 to vector<8x128xf32>
    %7 = arith.addf %6, %5 : vector<8x128xf32>
    %cst_4 = arith.constant 0.000000e+00 : f32
    %8 = vector.broadcast %cst_4 : f32 to vector<8x128xf32>
    %9 = arith.maximumf %0, %8 : vector<8x128xf32>
    %10 = arith.mulf %0, %1 : vector<8x128xf32>
    %11 = arith.subf %9, %10 : vector<8x128xf32>
    %12 = math.log1p %5 : vector<8x128xf32>
    %13 = arith.addf %11, %12 : vector<8x128xf32>
    %14 = tpu.reciprocal %7 {approx = true} : vector<8x128xf32> -> vector<8x128xf32>
    %15 = arith.mulf %7, %14 : vector<8x128xf32>
    %cst_5 = arith.constant 2.000000e+00 : f32
    %16 = vector.broadcast %cst_5 : f32 to vector<8x128xf32>
    %17 = arith.subf %16, %15 : vector<8x128xf32>
    %18 = arith.mulf %14, %17 : vector<8x128xf32>
    %cst_6 = arith.constant 0.000000e+00 : f32
    %19 = vector.broadcast %cst_6 : f32 to vector<8x128xf32>
    %20 = arith.cmpf oge, %0, %19 : vector<8x128xf32>
    %21 = arith.mulf %5, %18 : vector<8x128xf32>
    %22 = arith.select %20, %18, %21 : vector<8x128xi1>, vector<8x128xf32>
    %cst_7 = arith.constant dense<0.000000e+00> : vector<128xf32>
    %23 = vector.multi_reduction <add>, %13, %cst_7 [0] : vector<8x128xf32> to vector<128xf32>
    %24 = vector.shape_cast %23 : vector<128xf32> to vector<1x128xf32>
    %25 = arith.mulf %22, %1 : vector<8x128xf32>
    %cst_8 = arith.constant dense<0.000000e+00> : vector<128xf32>
    %26 = vector.multi_reduction <add>, %25, %cst_8 [0] : vector<8x128xf32> to vector<128xf32>
    %27 = vector.shape_cast %26 : vector<128xf32> to vector<1x128xf32>
    %28 = arith.addf %22, %1 : vector<8x128xf32>
    %cst_9 = arith.constant dense<0.000000e+00> : vector<128xf32>
    %29 = vector.multi_reduction <add>, %28, %cst_9 [0] : vector<8x128xf32> to vector<128xf32>
    %30 = vector.shape_cast %29 : vector<128xf32> to vector<1x128xf32>
    %cst_10 = arith.constant 0.000000e+00 : f32
    %31 = vector.broadcast %cst_10 : f32 to vector<5x128xf32>
    %32 = tpu.concatenate %24, %27, %30, %31 in 0 : vector<1x128xf32>, vector<1x128xf32>, vector<1x128xf32>, vector<5x128xf32> -> vector<8x128xf32>
    %c0_11 = arith.constant 0 : index
    %c0_12 = arith.constant 0 : index
    %c0_13 = arith.constant 0 : index
    %33 = vector.load %arg3[%c0_11, %c0_12, %c0_13] : memref<1x8x128xf32, #tpu.memory_space<vmem>>, vector<1x8x128xf32>
    %34 = vector.shape_cast %33 : vector<1x8x128xf32> to vector<8x128xf32>
    %35 = vector.shape_cast %32 : vector<8x128xf32> to vector<1x8x128xf32>
    tpu.vector_store %arg3[%c0_11, %c0_12, %c0_13], %35 {strides = array<i32>} : memref<1x8x128xf32, #tpu.memory_space<vmem>>, vector<1x8x128xf32>,
    return
  }
  func.func @transform_0(%arg0: i32) -> (i32, i32) {
    %c0_i32 = arith.constant 0 : i32
    %c0_i32_0 = arith.constant 0 : i32
    return %arg0, %c0_i32 : i32, i32
  }
  func.func @transform_1(%arg0: i32) -> (i32, i32) {
    %c0_i32 = arith.constant 0 : i32
    %c0_i32_0 = arith.constant 0 : i32
    return %arg0, %c0_i32 : i32, i32
  }
  func.func @transform_2(%arg0: i32) -> (i32, i32, i32) {
    %c0_i32 = arith.constant 0 : i32
    %c0_i32_0 = arith.constant 0 : i32
    %c0_i32_1 = arith.constant 0 : i32
    return %arg0, %c0_i32, %c0_i32_0 : i32, i32, i32
  }
}

</mosaic_0001>

<bundles_post_ra>
// kernel: tpu_custom_call.1
= control target key start
LH: loop header
LB: loop body
LE: loop exit
PB: predicated region body
PF: predicated region fallthrough
CT: control target
= control target key end

     0   :  { %7 = vsyncpa [#allocation3], 0  ;;  %s778_s0 = inlined_call_operand.hbm [shape: f32[16,128], index: 0, kind: input, shape index: {}]   ;;  %s779_s1 = inlined_call_operand.hbm [shape: f32[16,128], index: 1, kind: input, shape index: {}]   ;;  %s780_s2 = inlined_call_operand.hbm [shape: f32[2,8,128], index: 2, kind: output, shape index: {}]  }
   0x1   :  { %9 = vsyncpa [#allocation3 + $0x1], 0 }
   0x2   :  { %10 = vsyncpa [#allocation6], 0 }
   0x3   :  { %12 = vsyncpa [#allocation6 + $0x1], 0 }
   0x4   :  { %13 = vsyncpa [#allocation4], 0 }
   0x5   :  { %15 = vsyncpa [#allocation4 + $0x1], 0  ;;  %s573_s9 = smov 0   ;;  %s575_s10 = smov 0  }
   0x6   :  { %s577_s11 = smov 0   ;;  %s579_s12 = smov 0  }
   0x7 LB: > { %s594_s13 = sadd.s32 4294967295, %s553_s12   ;;  %s357_s14 = sadd.s32 4294967294, %s553_s12   ;;  %s553_s12 = sphi %s579_s12, %s799_s12   ;;  %s549_s11 = sphi %s577_s11, %s798_s11   ;;  %s545_s10 = sphi %s575_s10, %s797_s10   ;;  %s541_s9 = sphi %s573_s9, %s796_s9  }
   0x8   : > { %s598_s15 = sadd.s32 1, %s553_s12   ;;  %s28_s16 = sadd.s32 1, %s549_s11 }
   0x9   : > { %s25_s17 = ssub.s32 %s553_s12, %s598_s15  ;;  %p35_p0 = scmp.ne.s32.totalorder %s549_s11, %s545_s10 }
   0xa   : > { %p26_p1 = scmp.eq.s32.totalorder %s25_s17, 0  ;;  %p36_p2 = scmp.eq.s32.totalorder %s553_s12, 0 }
   0xb   : > { %p41_p3 = scmp.ne.s32.totalorder %s545_s10, %s541_s9  ;;  %p42_p4 = scmp.eq.s32.totalorder %s594_s13, 0 }
   0xc   : > { %s610_s18 = scalar_select %p26_p1, %s549_s11, %s28_s16  }
   0xd   : > { %p612_p5 = por %p36_p2, %p35_p0  ;;  %p616_p6 = por %p42_p4, %p41_p3 }
   0xe   : > { %p91_p7 = scmp.eq.s32.totalorder %s594_s13, 1  ;;  %p97_p8 = scmp.eq.s32.totalorder %s357_s14, 1 }
   0xf   : > { %s784_s20 = scalar_select %p616_p6, 1, 0 }
  0x10   : > { %p389_p10 = scmp.lt.s32.totalorder %s553_s12, 2  ;;  %p623_p11 = por %p91_p7, %p35_p0 }
  0x11   : > { %p627_p12 = por %p97_p8, %p41_p3  ;;  %s632_s23 = sand.u32 1, %s549_s11  }
  0x12   : > { %s785_s21 = scalar_select %p623_p11, 1, 0 }
  0x13   : > { %s786_s22 = scalar_select %p627_p12, 1, 0 }
  0x14   : > { %s361_s24 = sshll.u32 %s553_s12, 7  ;;  %s360_s25 = sshll.u32 %s632_s23, 3 }
  0x15   : > { %s641_s28 = scalar_lea.hbm %s778_s0, %s361_s24  ;;  %s121_s29 = scalar_lea.vmem [#allocation2], %s360_s25 }
  0x16   : > { %s128_s30 = sshll.u32 %s121_s29, 4  ;;  %p647_p13 = pnand %p389_p10, %p612_p5  ;;  %s651_s30 = int_to_ptr.vmem [resolvable:$true] %s128_s30 }
  0x17   : > { %s118_s4 = scalar_lea.sflag [#allocation3], %s632_s23  ;;  %s429_s5 = scalar_lea.hbm %s641_s28, 128 }
  0x18   : > { %p430_p2 = scmp.ne.s32.totalorder %s641_s28, %s429_s5  ;;  %p431_p3 = pneg %p647_p13 }
  0x19   : > { %s434_s8 = scalar_lea.hbm %s778_s0, 256  ;;  %p435_p5 = scmp.lt.s32.totalorder %s641_s28, %s778_s0 }
  0x1a   : > { %p432_p4 = pnand %p431_p3, %p430_p2  ;;  %p436_p8 = scmp.lt.s32.totalorder %s434_s8, %s429_s5 }
  0x1c   : > { %p433_p7 = pneg %p432_p4  ;;  %p437_p10 = por %p436_p8, %p435_p5 }
  0x1e   : > { %p438_p9 = pnand %p437_p10, %p433_p7 }
  0x20   : > { %441 = shalt.err (!%p438_p9)
}
  0x21   : > { %s442_s17 = scalar_lea.vmem %s651_s30, 128  ;;  %s555_s19 = smov [#allocation2]  }
  0x22   : > { %p443_p0 = scmp.ne.s32.totalorder %s651_s30, %s442_s17  ;;  %s447_s26 = sshll.u32 %s555_s19, 4  ;;  %s448_s26 = int_to_ptr.vmem [resolvable:$false] %s447_s26 }
  0x23   : > { %s449_s27 = scalar_lea.vmem %s448_s26, 256  ;;  %p450_p1 = scmp.lt.s32.totalorder %s651_s30, %s448_s26 }
  0x24   : > { %p445_p2 = pnand %p443_p0, %p431_p3  ;;  %p451_p12 = scmp.lt.s32.totalorder %s449_s27, %s442_s17 }
  0x26   : > { %p446_p4 = pneg %p445_p2  ;;  %p452_p11 = por %p451_p12, %p450_p1 }
  0x28   : > { %p453_p5 = pnand %p452_p11, %p446_p4 }
  0x2a   : > { %456 = shalt.err (!%p453_p5)
}
  0x2b   : > { %381 = dma.hbm_to_vmem [thread:$0]  (!%p647_p13), %s641_s28, 128, %s651_s30, %s118_s4  }
  0x2c   : > { %p788_p9 = scmp.lt.s32.totalorder %s553_s12, 3  ;;  %p789_p0 = scmp.ge.s32.totalorder %s553_s12, 1 }
  0x2d   : > { %s693_s7 = scalar_lea.hbm %s779_s1, %s361_s24  ;;  %s139_s8 = scalar_lea.vmem [#allocation5], %s360_s25 }
  0x2e   : > { %p684_p7 = pnand %p789_p0, %p788_p9  ;;  %s146_s14 = sshll.u32 %s139_s8, 4  ;;  %s147_s14 = int_to_ptr.vmem [resolvable:$true] %s146_s14 }
  0x2f   : > { %s136_s28 = scalar_lea.sflag [#allocation6], %s632_s23  ;;  %s457_s30 = scalar_lea.hbm %s693_s7, 128 }
  0x30   : > { %s790_s29 = scalar_select %p684_p7, 1, 0 }
  0x31   : > { %p458_p11 = scmp.ne.s32.totalorder %s693_s7, %s457_s30  ;;  %s462_s17 = scalar_lea.hbm %s779_s1, 256 }
  0x32   : > { %p463_p8 = scmp.lt.s32.totalorder %s693_s7, %s779_s1  ;;  %p464_p10 = scmp.lt.s32.totalorder %s462_s17, %s457_s30 }
  0x33   : > { %p460_p12 = pnand %p458_p11, %p431_p3 }
  0x34   : > { %p465_p2 = por %p464_p10, %p463_p8 }
  0x35   : > { %p461_p1 = pneg %p460_p12 }
  0x37   : > { %p466_p4 = pnand %p465_p2, %p461_p1 }
  0x39   : > { %469 = shalt.err (!%p466_p4)
}
  0x3a   : > { %s470_s25 = scalar_lea.vmem %s147_s14, 128  ;;  %s556_s23 = smov [#allocation5]  }
  0x3b   : > { %p471_p5 = scmp.ne.s32.totalorder %s147_s14, %s470_s25  ;;  %s475_s26 = sshll.u32 %s556_s23, 4  ;;  %s476_s26 = int_to_ptr.vmem [resolvable:$false] %s475_s26 }
  0x3c   : > { %s477_s27 = scalar_lea.vmem %s476_s26, 256  ;;  %p478_p11 = scmp.lt.s32.totalorder %s147_s14, %s476_s26 }
  0x3d   : > { %p473_p9 = pnand %p471_p5, %p431_p3  ;;  %p479_p12 = scmp.lt.s32.totalorder %s477_s27, %s470_s25 }
  0x3f   : > { %p474_p0 = pneg %p473_p9  ;;  %p480_p6 = por %p479_p12, %p478_p11 }
  0x41   : > { %p481_p7 = pnand %p480_p6, %p474_p0 }
  0x43   : > { %484 = shalt.err (!%p481_p7)
}
  0x44   : > { %384 = dma.hbm_to_vmem [thread:$0]  (!%p647_p13), %s693_s7, 128, %s147_s14, %s136_s28  }
  0x45   : > { %p791_p1 = scmp.ne.s32.totalorder %s790_s29, 0 }
  0x46   : > { %s719_s5 = sand.u32 (!%p791_p1), 1, %s545_s10   ;;  %p792_p6 = scmp.ne.s32.totalorder (!%p791_p1), %s784_s20, 0 }
  0x47   : > { %155 = sbr.rel (%p791_p1) target bundleno = 156 (0x9c), region = 28  ;;  %s722_s6 = sshll.u32 (!%p791_p1), %s719_s5, 3 }
  0x48   : > { %s158_s8 = scalar_lea.sflag (!%p791_p1), [#allocation3], %s719_s5  ;;  %s161_s30 = scalar_lea.vmem (!%p791_p1), [#allocation2], %s722_s6 }
  0x4c   : > { %528 = dma.done.wait (%p792_p6), %s158_s8, 128  }
  0x4d   : > { %530 = vsyncadd (%p792_p6), %s158_s8, 4294967168  ;;  %s167_s3 = scalar_lea.sflag [#allocation6], %s719_s5  ;;  %s170_s29 = scalar_lea.vmem [#allocation5], %s722_s6 }
  0x4e   : > { %532 = dma.done.wait (%p792_p6), %s167_s3, 128  }
  0x4f   : > { %534 = vsyncadd (%p792_p6), %s167_s3, 4294967168  ;;  %v196_v0 = vld [vmem:[%s161_s30] sm:$0xff]  ;;  %v197_v7 = vld [vmem:[%s170_s29] sm:$0xff]  ;;  %vm243_vm2 = vcmask 1040384   ;;  %vm245_vm3 = vcmask 1041408   ;;  %s195_s20 = scalar_lea.vmem [#allocation7], %s722_s6 }
  0x50   : > { %v198_v1 = vand.u32 2147483647, %v196_v0  ;;  %v203_v9 = vmax.f32 %v196_v0, 0.0  ;;  %v204_v10 = vmul.f32 %v197_v7, %v196_v0  ;;  %vm220_vm1 = vcmp.ge.f32.partialorder %v196_v0, 0.0  ;;  %s264_s7 = sshll.u32 %s195_s20, 4  ;;  %s369_s14 = sshll.u32 %s594_s13, 7  ;;  %s738_s7 = int_to_ptr.vmem [resolvable:$true] %s264_s7 }
  0x51   : > { %vm247_vm4 = vcmask 1042432   ;;  %s262_s16 = scalar_lea.hbm %s780_s2, %s369_s14  ;;  %s251_s17 = scalar_lea.sflag [#allocation4], %s719_s5 }
  0x52   : > { %v199_v2 = vsub.f32 0.0, %v198_v1  ;;  %v205_v14 = vsub.f32 %v203_v9, %v204_v10  ;;  %s485_s24 = scalar_lea.vmem %s738_s7, 128  ;;  %p793_p3 = scmp.ne.s32.totalorder %s785_s21, 0 }
  0x53   : > { %p486_p13 = scmp.ne.s32.totalorder %s738_s7, %s485_s24  ;;  %s557_s13 = smov [#allocation7]  }
  0x54   : > { %v200_v3 = vmul.f32 1.442695, %v199_v2  ;;  %s489_s19 = sshll.u32 %s557_s13, 4  ;;  %s490_s19 = int_to_ptr.vmem [resolvable:$false] %s489_s19 }
  0x55   : > { %p487_p7 = pnand %p486_p13, %p793_p3  ;;  %s491_s25 = scalar_lea.vmem %s490_s19, 256 }
  0x56   : > { %423 = vpow2.f32 %v200_v3  ;;  %p492_p10 = scmp.lt.s32.totalorder %s738_s7, %s490_s19  ;;  %p493_p2 = scmp.lt.s32.totalorder %s491_s25, %s485_s24 }
  0x57   : > { %p488_p8 = pneg %p487_p7 }
  0x58   : > { %p494_p4 = por %p493_p2, %p492_p10 }
  0x5a   : > { %p495_p5 = pnand %p494_p4, %p488_p8 }
  0x63   : > { %v424_v4 = vpop.eup %423 }
  0x64   : > { %v202_v5 = vadd.f32 1.0, %v424_v4  ;;  %v209_v6 = vmul.f32 -0.5, %v424_v4  ;;  %v212_v11 = vand.u32 2147483647, %v424_v4 }
  0x66   : > { %425 = vlog2.f32 %v202_v5  ;;  %v210_v8 = vadd.f32 1.0, %v209_v6  ;;  %vm213_vm0 = vcmp.lt.f32.partialorder %v212_v11, 0.0004427343 }
  0x67   : > { %427 = vrcp.f32 %v202_v5 }
  0x68   : > { %v211_v12 = vmul.f32 %v424_v4, %v210_v8 }
  0x73   : > { %v426_v13 = vpop.eup %425 }
  0x74   : > { %v428_v15 = vpop.eup %427  ;;  %v208_v16 = vmul.f32 0.6931472, %v426_v13 }
  0x75   : > { %v217_v17 = vmul.f32 %v428_v15, %v202_v5 }
  0x76   : > { %v214_v18 = vsel %vm213_vm0, %v211_v12, %v208_v16 }
  0x77   : > { %v215_v19 = vadd.f32 %v214_v18, %v205_v14  ;;  %v218_v20 = vsub.f32 2.0, %v217_v17 }
  0x79   : > { %v219_v21 = vmul.f32 %v428_v15, %v218_v20  ;;  %v223_v22 = vrot.slane %v215_v19, 4 }
  0x7b   : > { %v221_v23 = vmul.f32 %v424_v4, %v219_v21  ;;  %v224_v24 = vadd.f32 %v223_v22, %v215_v19 }
  0x7d   : > { %v222_v25 = vsel %vm220_vm1, %v219_v21, %v221_v23  ;;  %v225_v26 = vrot.slane %v224_v24, 2 }
  0x7e   : > { %v229_v27 = vmul.f32 %v222_v25, %v197_v7  ;;  %v236_v28 = vadd.f32 %v222_v25, %v197_v7 }
  0x7f   : > { %v226_v29 = vadd.f32 %v225_v26, %v224_v24 }
  0x80   : > { %v230_v30 = vrot.slane %v229_v27, 4  ;;  %v237_v31 = vrot.slane %v236_v28, 4 }
  0x81   : > { %v227_v34 = vrot.slane %v226_v29, 1 }
  0x82   : > { %v231_v32 = vadd.f32 %v230_v30, %v229_v27  ;;  %v238_v33 = vadd.f32 %v237_v31, %v236_v28 }
  0x83   : > { %v228_v39 = vadd.f32 %v227_v34, %v226_v29 }
  0x84   : > { %v232_v35 = vrot.slane %v231_v32, 2  ;;  %v239_v36 = vrot.slane %v238_v33, 2 }
  0x86   : > { %v233_v37 = vadd.f32 %v232_v35, %v231_v32  ;;  %v240_v38 = vadd.f32 %v239_v36, %v238_v33 }
  0x88   : > { %v234_v40 = vrot.slane %v233_v37, 1  ;;  %v241_v41 = vrot.slane %v240_v38, 1 }
  0x8a   : > { %v235_v42 = vadd.f32 %v234_v40, %v233_v37  ;;  %v242_v43 = vadd.f32 %v241_v41, %v240_v38 }
  0x8c   : > { %v244_v44 = vsel %vm243_vm2, %v228_v39, %v235_v42 }
  0x8d   : > { %v246_v45 = vsel %vm245_vm3, %v244_v44, %v242_v43 }
  0x8e   : > { %v248_v46 = vsel %vm247_vm4, %v246_v45, 0.0 }
  0x8f   : > { %249 = vst [vmem:[%s195_s20] sm:$0xff] %v248_v46 }
  0x90   : > { %498 = shalt.err (!%p495_p5)
}
  0x91   : > { %s499_s23 = scalar_lea.hbm %s262_s16, 128  ;;  %s503_s5 = scalar_lea.hbm %s780_s2, 256 }
  0x92   : > { %p500_p9 = scmp.ne.s32.totalorder %s262_s16, %s499_s23  ;;  %p504_p12 = scmp.lt.s32.totalorder %s262_s16, %s780_s2 }
  0x93   : > { %p505_p1 = scmp.lt.s32.totalorder %s503_s5, %s499_s23 }
  0x94   : > { %p501_p0 = pnand %p500_p9, %p793_p3 }
  0x95   : > { %p506_p6 = por %p505_p1, %p504_p12 }
  0x96   : > { %p502_p11 = pneg %p501_p0 }
  0x98   : > { %p507_p13 = pnand %p506_p6, %p502_p11 }
  0x9a   : > { %510 = shalt.err (!%p507_p13)
}
  0x9b   : > { %376 = dma.vmem_to_hbm [thread:$0]  (%p793_p3), %s738_s7, 128, %s262_s16, %s251_s17  }
  0x9c PF: > { %s276_s30 = sand.u32 1, %s541_s9   ;;  %p794_p7 = scmp.ne.s32.totalorder %s786_s22, 0 }
  0x9d   : > { %p795_p8 = scmp.ge.s32.totalorder %s553_s12, 2  ;;  %s277_s3 = scalar_lea.sflag [#allocation4], %s276_s30 }
  0x9f   : > { %p386_p10 = pnand %p795_p8, %p794_p7 }
  0xa1   : > { %p387_p2 = pneg %p386_p10 }
  0xa3   : > { %536 = dma.done.wait (%p387_p2), %s277_s3, 128  }
  0xa4   : > { %538 = vsyncadd (%p387_p2), %s277_s3, 4294967168  ;;  %p18_p4 = scmp.ge.s32.totalorder %s598_s15, 4   ;;  %s796_s9 = smov %s545_s10 }
  0xa5   : > { %s797_s10 = smov %s549_s11  ;;  %s798_s11 = smov %s610_s18 }
  0xa6   : > { %s799_s12 = smov %s598_s15  ;;  %20 = sbr.rel (!%p18_p4) target bundleno = 7 (0x7), region = 86 }
  0xab   :  { %282 = vsyncpa [#allocation3], 1 }
  0xac   :  { %284 = vsyncpa [#allocation3 + $0x1], 1 }
  0xad   :  { %285 = vsyncpa [#allocation6], 1 }
  0xae   :  { %287 = vsyncpa [#allocation6 + $0x1], 1 }
  0xaf   :  { %288 = vsyncpa [#allocation4], 1 }
  0xb0   :  { %290 = vsyncpa [#allocation4 + $0x1], 1 }

</bundles_post_ra>
